<compile_context>
chip_gen: v6e
topology: v6e:2x2x1
jax: 0.10.0
libtpu: 0.0.40
codegen_flags: <defaults>
</compile_context>

<pallas_src>
import math

import jax
import jax.numpy as jnp
from jax.experimental import pallas as pl
from jax.experimental.pallas import tpu as pltpu


_LANE = 128
_SUBLANE = 8


def _round_up(x, m):
    return ((x + m - 1) // m) * m


def _round_down(x, m):
    return (x // m) * m


def _vmem_budgets():
    """Return (vmem_limit_bytes, block_budget_bytes), generation-aware."""
    try:
        cap = pltpu.get_tpu_info().vmem_capacity_bytes
    except Exception:
        cap = None
    if cap is None or cap <= 64 * 1024 * 1024:
        # v7x-sized (64 MiB physical) or unknown: leave headroom for Mosaic
        # internal scratch / semaphores.
        return 52 * 1024 * 1024, 22 * 1024 * 1024
    # v5e / v6e: 128 MiB physical VMEM.
    return 100 * 1024 * 1024, 56 * 1024 * 1024


# ---------------------------------------------------------------------------
# Kernels
# ---------------------------------------------------------------------------

def _fma_3d_kernel(x_ref, w_ref, b_ref, o_ref):
    # x_ref: (TB, F)      -- batch on sublanes, features on lanes
    # w_ref, b_ref: (F, TD) -- constant along the batch grid axis (resident)
    # o_ref: (TB, F, TD)  -- already lane-dense (TD is a multiple of 128)
    x3 = x_ref[...][:, :, None]                      # in-kernel (TB,F,1) expand
    o_ref[...] = (w_ref[...] * x3 + b_ref[...]).astype(o_ref.dtype)


def _fma_flat_kernel(x_ref, w_ref, b_ref, o_ref):
    # x_ref: (TB, TF); w_ref, b_ref: (TF, D); o_ref: (TB, TF*D) lane-dense.
    # One vectorized FMA + a single relayout-reshape + ONE full-block store
    # (dense unmasked vst rows) instead of per-feature masked stripe stores.
    tb, tf = x_ref.shape
    d = w_ref.shape[-1]
    y = w_ref[...] * x_ref[...][:, :, None] + b_ref[...]      # (TB, TF, D)
    o_ref[...] = y.reshape(tb, tf * d).astype(o_ref.dtype)


# ---------------------------------------------------------------------------
# Wrapper
# ---------------------------------------------------------------------------

def linear_embeddings(x, weight, bias=None, *, block_budget_bytes=None):
    """LinearEmbeddings forward: out[b, f, d] = weight[f, d] * x[b, f] + bias[f, d].

    x: (B, F); weight/bias: (F, D)  ->  (B, F, D)
    `block_budget_bytes` overrides the VMEM block budget (used by tests to
    force the feature/embedding chunking paths at small shapes).
    """
    assert x.ndim == 2
    B, F = x.shape
    Fw, D = weight.shape
    assert F == Fw, (F, Fw)
    if bias is None:
        bias = jnp.zeros_like(weight)

    # Compute happens in the naturally promoted dtype (matches the PyTorch
    # module, which multiplies in the parameter dtype).
    out_dtype = jnp.result_type(x.dtype, weight.dtype, bias.dtype)
    o_is = jnp.dtype(out_dtype).itemsize
    x_is = jnp.dtype(x.dtype).itemsize
    w_is = jnp.dtype(weight.dtype).itemsize
    acc_is = max(o_is, 4)  # budget the in-kernel intermediate at f32 width

    vmem_limit, budget = _vmem_budgets()
    if block_budget_bytes is not None:
        budget = int(block_budget_bytes)
    wb_budget = budget // 2          # <= ~half the budget for resident weight+bias

    flat = (D % _LANE) != 0          # lane-dense flat output when D is unaligned

    if flat:
        # Feature chunk TF: full F if the double-buffered weight+bias blocks
        # fit, else a multiple of 128 (keeps the x block's and the flat output
        # block's lane dims 128-aligned).
        d_pad = _round_up(D, _LANE)
        max_tf = wb_budget // max(4 * d_pad * w_is, 1)
        if max_tf >= F or F <= _LANE:
            TF = F
        else:
            TF = max(_LANE, _round_down(max_tf, _LANE))
        tf_pad = _round_up(TF, _SUBLANE)
        x_row = _round_up(TF, _LANE) * x_is
        out_row = _round_up(TF * D, _LANE) * o_is
        acc_row = tf_pad * d_pad * acc_is          # lane-padded (TB,TF,D) intermediate
        wb_block = tf_pad * d_pad * w_is
        per_row = 2 * (x_row + out_row) + acc_row  # x/out double-buffered + scratch
        resident = 2 * 2 * wb_block                # weight + bias, double-buffered
    else:
        # Embedding chunk TD (multiple of 128): full D if weight+bias fit.
        f_pad = _round_up(F, _SUBLANE)
        max_td = wb_budget // max(4 * f_pad * w_is, 1)
        if max_td >= D:
            TD = D
        else:
            TD = max(_LANE, _round_down(max_td, _LANE))
        x_row = _round_up(F, _LANE) * x_is
        out_row = f_pad * TD * o_is
        wb_block = f_pad * TD * w_is
        per_row = 2 * (x_row + out_row)
        resident = 2 * 2 * wb_block

    # Batch tile: as large as the VMEM block budget allows (no artificial cap),
    # but at most ceil(B/2) rounded to 8 so both v7x TensorCores get work.
    TB = (budget - resident) // max(per_row, 1)
    TB = max(_SUBLANE, _round_down(TB, _SUBLANE))
    TB = min(TB, _round_up(pl.cdiv(B, 2), _SUBLANE))
    TB = int(TB)
    nb = pl.cdiv(B, TB)

    cost = pl.CostEstimate(
        flops=2 * B * F * D,
        transcendentals=0,
        bytes_accessed=B * F * D * o_is + B * F * x_is + 2 * F * D * w_is,
    )
    compiler_params = pltpu.CompilerParams(
        dimension_semantics=("parallel", "parallel"),
        vmem_limit_bytes=vmem_limit,
    )

    if flat:
        nj = pl.cdiv(F, TF)
        out = pl.pallas_call(
            _fma_flat_kernel,
            out_shape=jax.ShapeDtypeStruct((B, F * D), out_dtype),
            grid_spec=pltpu.PrefetchScalarGridSpec(
                num_scalar_prefetch=0,
                grid=(nb, nj),
                in_specs=[
                    pl.BlockSpec((TB, TF), lambda i, j: (i, j)),
                    pl.BlockSpec((TF, D), lambda i, j: (j, 0)),
                    pl.BlockSpec((TF, D), lambda i, j: (j, 0)),
                ],
                out_specs=pl.BlockSpec((TB, TF * D), lambda i, j: (i, j)),
            ),
            compiler_params=compiler_params,
            cost_estimate=cost,
        )(x, weight, bias)
        # Row-major (B, F*D) -> (B, F, D) is a free metadata reshape (no copy).
        return out.reshape(B, F, D)

    nj = pl.cdiv(D, TD)
    out = pl.pallas_call(
        _fma_3d_kernel,
        out_shape=jax.ShapeDtypeStruct((B, F, D), out_dtype),
        grid_spec=pltpu.PrefetchScalarGridSpec(
            num_scalar_prefetch=0,
            grid=(nb, nj),
            in_specs=[
                pl.BlockSpec((TB, F), lambda i, j: (i, 0)),
                pl.BlockSpec((F, TD), lambda i, j: (0, j)),
                pl.BlockSpec((F, TD), lambda i, j: (0, j)),
            ],
            out_specs=pl.BlockSpec((TB, F, TD), lambda i, j: (i, 0, j)),
        ),
        compiler_params=compiler_params,
        cost_estimate=cost,
    )(x, weight, bias)
    return out


def init_linear_embeddings_params(key, n_features, d_embedding, dtype=jnp.float32):
    # Matches _initialize_embeddings: uniform(-1/sqrt(d), 1/sqrt(d)), d = d_embedding.
    d_sqrt_inv = 1.0 / math.sqrt(d_embedding)
    k_w, k_b = jax.random.split(key)
    weight = jax.random.uniform(
        k_w, (n_features, d_embedding), dtype=dtype,
        minval=-d_sqrt_inv, maxval=d_sqrt_inv)
    bias = jax.random.uniform(
        k_b, (n_features, d_embedding), dtype=dtype,
        minval=-d_sqrt_inv, maxval=d_sqrt_inv)
    return weight, bias


if __name__ == "__main__":
    root = jax.random.PRNGKey(0)

    def check(B, F, D, **kw):
        k = jax.random.fold_in(root, B * 100003 + F * 1009 + D)
        k_x, k_p = jax.random.split(k)
        x = jax.random.normal(k_x, (B, F), dtype=jnp.float32)
        w, b = init_linear_embeddings_params(k_p, F, D)
        out = jax.block_until_ready(linear_embeddings(x, w, b, **kw))
        ref = w[None] * x[..., None] + b[None]
        assert out.shape == (B, F, D), (out.shape, (B, F, D))
        assert jnp.allclose(out, ref, atol=1e-6, rtol=1e-6), ("mismatch", B, F, D)

    # Flat lane-dense path (D % 128 != 0), single ragged batch block.
    check(2, 4, 32)
    # 3-D path (D % 128 == 0).
    check(2, 4, 128)
    # Multiple batch blocks with a ragged last block, on both paths.
    check(20, 5, 24)
    check(20, 3, 256)
    # Force the second grid axis (embedding / feature chunking) with a tiny
    # block budget so those guard paths are exercised at small shapes too.
    check(12, 4, 512, block_budget_bytes=96 * 1024)     # 3-D path, TD < D
    check(12, 192, 8, block_budget_bytes=256 * 1024)    # flat path, TF < F

    print("KERNEL_OK")
</pallas_src>

<mosaic_0001>
module attributes {stable_mosaic.version = 11 : i64} {
  func.func @_fma_flat_kernel(%arg0: i32, %arg1: i32, %arg2: memref<8x4xf32, #tpu.memory_space<vmem>>, %arg3: memref<4x32xf32, #tpu.memory_space<vmem>>, %arg4: memref<4x32xf32, #tpu.memory_space<vmem>>, %arg5: memref<8x128xf32, #tpu.memory_space<vmem>>) attributes {dimension_semantics = [#tpu.dimension_semantics<parallel>, #tpu.dimension_semantics<parallel>], iteration_bounds = array<i64: 1, 1>, scalar_prefetch = 0 : i64, scratch_operands = 0 : i64, tpu.core_type = #tpu.core_type<tc>, window_params = [{transform_indices = @transform_0, window_bounds = array<i64: 8, 4>}, {transform_indices = @transform_1, window_bounds = array<i64: 4, 32>}, {transform_indices = @transform_2, window_bounds = array<i64: 4, 32>}, {transform_indices = @transform_3, window_bounds = array<i64: 8, 128>}]} {
    %c0 = arith.constant 0 : index
    %c0_0 = arith.constant 0 : index
    %0 = vector.load %arg3[%c0, %c0_0] : memref<4x32xf32, #tpu.memory_space<vmem>>, vector<4x32xf32>
    %c0_1 = arith.constant 0 : index
    %c0_2 = arith.constant 0 : index
    %1 = vector.load %arg2[%c0_1, %c0_2] : memref<8x4xf32, #tpu.memory_space<vmem>>, vector<8x4xf32>
    %2 = vector.shape_cast %1 : vector<8x4xf32> to vector<8x4x1xf32>
    %3 = vector.shape_cast %0 : vector<4x32xf32> to vector<1x4x32xf32>
    %4 = vector.broadcast %3 : vector<1x4x32xf32> to vector<8x4x32xf32>
    %5 = vector.broadcast %2 : vector<8x4x1xf32> to vector<8x4x32xf32>
    %6 = arith.mulf %4, %5 : vector<8x4x32xf32>
    %c0_3 = arith.constant 0 : index
    %c0_4 = arith.constant 0 : index
    %7 = vector.load %arg4[%c0_3, %c0_4] : memref<4x32xf32, #tpu.memory_space<vmem>>, vector<4x32xf32>
    %8 = vector.shape_cast %7 : vector<4x32xf32> to vector<1x4x32xf32>
    %9 = vector.broadcast %8 : vector<1x4x32xf32> to vector<8x4x32xf32>
    %10 = arith.addf %6, %9 : vector<8x4x32xf32>
    %11 = vector.shape_cast %10 : vector<8x4x32xf32> to vector<8x128xf32>
    %c0_5 = arith.constant 0 : index
    %c0_6 = arith.constant 0 : index
    %12 = vector.load %arg5[%c0_5, %c0_6] : memref<8x128xf32, #tpu.memory_space<vmem>>, vector<8x128xf32>
    tpu.vector_store %arg5[%c0_5, %c0_6], %11 {strides = array<i32>} : memref<8x128xf32, #tpu.memory_space<vmem>>, vector<8x128xf32>,
    return
  }
  func.func @transform_0(%arg0: i32, %arg1: i32) -> (i32, i32) {
    %c0_i32 = arith.constant 0 : i32
    return %arg0, %arg1 : i32, i32
  }
  func.func @transform_1(%arg0: i32, %arg1: i32) -> (i32, i32) {
    %c0_i32 = arith.constant 0 : i32
    %c0_i32_0 = arith.constant 0 : i32
    return %arg1, %c0_i32 : i32, i32
  }
  func.func @transform_2(%arg0: i32, %arg1: i32) -> (i32, i32) {
    %c0_i32 = arith.constant 0 : i32
    %c0_i32_0 = arith.constant 0 : i32
    return %arg1, %c0_i32 : i32, i32
  }
  func.func @transform_3(%arg0: i32, %arg1: i32) -> (i32, i32) {
    %c0_i32 = arith.constant 0 : i32
    return %arg0, %arg1 : i32, i32
  }
}

</mosaic_0001>

<bundles_post_ra>
// kernel: tpu_custom_call.1
= control target key start
LH: loop header
LB: loop body
LE: loop exit
PB: predicated region body
PF: predicated region fallthrough
CT: control target
= control target key end

     0   :  { %8 = vsyncpa [#allocation3], 0  ;;  %s389_s0 = inlined_call_operand.hbm [shape: f32[2,4], index: 0, kind: input, shape index: {}]   ;;  %s390_s1 = inlined_call_operand.hbm [shape: f32[4,32], index: 1, kind: input, shape index: {}]   ;;  %s391_s2 = inlined_call_operand.hbm [shape: f32[4,32], index: 2, kind: input, shape index: {}]   ;;  %s392_s3 = inlined_call_operand.hbm [shape: f32[2,128], index: 3, kind: output, shape index: {}]  }
   0x1   :  { %9 = vsyncpa [#allocation6], 0 }
   0x2   :  { %10 = vsyncpa [#allocation4], 0 }
   0x3   :  { %15 = vsyncadd [#allocation3], 96  ;;  %s328_s12 = smov [#allocation5]   ;;  %s329_s14 = smov [#allocation2]  }
   0x4   :  { %s29_s13 = sshll.u32 %s328_s12, 4  ;;  %s16_s15 = sshll.u32 %s329_s14, 4  ;;  %s30_s13 = int_to_ptr.vmem [resolvable:$true] %s29_s13  ;;  %s17_s15 = int_to_ptr.vmem [resolvable:$true] %s16_s15 }
   0x5   :  { %s250_s16 = scalar_lea.vmem %s30_s13, 64  ;;  %p255_p1 = scmp.lt.s32.totalorder %s30_s13, %s30_s13 }
   0x6   :  { %p251_p0 = scmp.ne.s32.totalorder %s30_s13, %s250_s16  ;;  %p256_p2 = scmp.lt.s32.totalorder %s250_s16, %s250_s16 }
   0x8   :  { %p257_p3 = por %p256_p2, %p255_p1 }
   0xa   :  { %p258_p4 = pnand %p257_p3, %p251_p0 }
   0xc   :  { %261 = shalt.err (!%p258_p4)
}
   0xd   :  { %32 = dma.hbm_to_vmem [thread:$0]  %s390_s1, 64, %s30_s13, [#allocation6]  }
   0xe   :  { %s270_s19 = scalar_lea.vmem %s17_s15, 32  ;;  %s274_s20 = scalar_lea.vmem %s17_s15, 128 }
   0xf   :  { %p271_p5 = scmp.ne.s32.totalorder %s17_s15, %s270_s19  ;;  %p275_p6 = scmp.lt.s32.totalorder %s17_s15, %s17_s15 }
  0x10   :  { %p276_p7 = scmp.lt.s32.totalorder %s274_s20, %s270_s19 }
  0x12   :  { %p277_p8 = por %p276_p7, %p275_p6 }
  0x14   :  { %p278_p9 = pnand %p277_p8, %p271_p5 }
  0x16   :  { %281 = shalt.err (!%p278_p9)
}
  0x17   :  { %s330_s21 = smov 32   ;;  %s331_s22 = smov 2  }
  0x18   :  { %22 = dma.hbm_to_vmem [thread:$0]  %s389_s0, 32, %s17_s15, [#allocation3], %s330_s21, %s330_s21, %s331_s22  }
  0x19   :  { %s332_s25 = smov [#allocation7]  }
  0x1a   :  { %s39_s26 = sshll.u32 %s332_s25, 4  ;;  %s40_s26 = int_to_ptr.vmem [resolvable:$true] %s39_s26 }
  0x1b   :  { %s290_s1 = scalar_lea.vmem %s40_s26, 64  ;;  %p295_p11 = scmp.lt.s32.totalorder %s40_s26, %s40_s26 }
  0x1c   :  { %p291_p10 = scmp.ne.s32.totalorder %s40_s26, %s290_s1  ;;  %p296_p12 = scmp.lt.s32.totalorder %s290_s1, %s290_s1 }
  0x1e   :  { %p297_p13 = por %p296_p12, %p295_p11 }
  0x20   :  { %p298_p0 = pnand %p297_p13, %p291_p10 }
  0x22   :  { %301 = shalt.err (!%p298_p0)
}
  0x23   :  { %42 = dma.hbm_to_vmem [thread:$0]  %s391_s2, 64, %s40_s26, [#allocation6]  }
  0x24   :  { %322 = dma.done.wait [#allocation3], 128  }
  0x25   :  { %323 = vsyncadd [#allocation3], 4294967168 }
  0x26   :  { %324 = dma.done.wait [#allocation6], 128  }
  0x27   :  { %325 = vsyncadd [#allocation6], 4294967168  ;;  %v54_v0 = vlaneseq  ;;  %v53_v6 = vld [vmem:[#allocation2] sm:$0xff]  ;;  %v52_v21 = vld [vmem:[#allocation5] sm:$0xf]  ;;  %s335_s0 = smov 64  }
  0x28   :  { %v333_v22 = vmov 1983009808   ;;  %v118_v30 = vld [vmem:[#allocation7] sm:$0xf]  ;;  %v334_v39 = vmov 1934713408  }
  0x29   :  { %v370_v1 = vshrl.u32 %v54_v0, 7  ;;  %v129_v23 = vunpack.c.l.s4 %v333_v22  ;;  %v162_v40 = vunpack.c.l.s4 %v334_v39  ;;  %s336_s2 = smov 96   ;;  %vm207_vm0 = vcmask 261120  }
  0x2a   :  { %vm209_vm1 = vcmask 523264   ;;  %vm211_vm2 = vcmask 785408  }
  0x2b   :  { %v70_v2 = vsub.s32 2, %v370_v1  ;;  %v56_v3 = vsub.s32 0, %v370_v1  ;;  %v77_v4 = vsub.s32 3, %v370_v1  ;;  %v63_v5 = vsub.s32 1, %v370_v1 }
  0x2c   :  { %v91_v11 = vsub.s32 5, %v370_v1  ;;  %v84_v12 = vsub.s32 4, %v370_v1  ;;  %v105_v15 = vsub.s32 7, %v370_v1  ;;  %v98_v16 = vsub.s32 6, %v370_v1 }
  0x2d   :  { %v71_v7 = vrot.slane %v53_v6, %v70_v2  ;;  %v57_v8 = vrot.slane %v53_v6, %v56_v3  ;;  %v78_v9 = vrot.slane %v53_v6, %v77_v4  ;;  %v64_v10 = vrot.slane %v53_v6, %v63_v5 }
  0x2e   :  { %v92_v13 = vrot.slane %v53_v6, %v91_v11  ;;  %v85_v14 = vrot.slane %v53_v6, %v84_v12  ;;  %v106_v17 = vrot.slane %v53_v6, %v105_v15  ;;  %v99_v18 = vrot.slane %v53_v6, %v98_v16 }
  0x2f   :  { %73 = vbcast.lane.b32.xlu1 %v71_v7, 256  ;;  %59 = vbcast.lane.b32.xlu0 %v57_v8, 256  ;;  %v130_v33 = vunpack.c.0.s8 %v129_v23  ;;  %v163_v50 = vunpack.c.0.s8 %v162_v40 }
  0x31   :  { %v133_v43 = vsub.s32 %v130_v33, %v370_v1  ;;  %v166_v58 = vsub.s32 %v163_v50, %v370_v1 }
  0x33   :  { %80 = vbcast.lane.b32.xlu1 %v78_v9, 256  ;;  %66 = vbcast.lane.b32.xlu0 %v64_v10, 256 }
  0x37   :  { %94 = vbcast.lane.b32.xlu1 %v92_v13, 256  ;;  %87 = vbcast.lane.b32.xlu0 %v85_v14, 256 }
  0x3b   :  { %108 = vbcast.lane.b32.xlu1 %v106_v17, 256  ;;  %101 = vbcast.lane.b32.xlu0 %v99_v18, 256 }
  0xa1   :  { %v74_v19 = vpop.permute.xlu1 %73  ;;  %v60_v20 = vpop.permute.xlu0 %59 }
  0xa2   :  { %v112_v26 = vmul.f32 %v74_v19, %v52_v21  ;;  %v110_v27 = vmul.f32 %v60_v20, %v52_v21 }
  0xa4   :  { %v121_v36 = vadd.f32 %v118_v30, %v112_v26  ;;  %v119_v37 = vadd.f32 %v118_v30, %v110_v27 }
  0xa5   :  { %v81_v24 = vpop.permute.xlu1 %80  ;;  %v67_v25 = vpop.permute.xlu0 %66 }
  0xa6   :  { %v113_v28 = vmul.f32 %v81_v24, %v52_v21  ;;  %v111_v29 = vmul.f32 %v67_v25, %v52_v21  ;;  %v127_v46 = vcombine.low %v119_v37, %v121_v36 }
  0xa8   :  { %v122_v31 = vadd.f32 %v118_v30, %v113_v28  ;;  %v120_v32 = vadd.f32 %v118_v30, %v111_v29  ;;  %v134_v55 = vrot.slane %v127_v46, %v133_v43 }
  0xa9   :  { %v95_v34 = vpop.permute.xlu1 %94  ;;  %v88_v35 = vpop.permute.xlu0 %87 }
  0xaa   :  { %v135_v38 = vcombine.low %v120_v32, %v122_v31  ;;  %v115_v41 = vmul.f32 %v95_v34, %v52_v21  ;;  %v114_v42 = vmul.f32 %v88_v35, %v52_v21 }
  0xac   :  { %v142_v49 = vrot.slane %v135_v38, %v133_v43  ;;  %v124_v51 = vadd.f32 %v118_v30, %v115_v41  ;;  %v123_v52 = vadd.f32 %v118_v30, %v114_v42 }
  0xad   :  { %v109_v44 = vpop.permute.xlu1 %108  ;;  %v102_v45 = vpop.permute.xlu0 %101 }
  0xae   :  { %v117_v47 = vmul.f32 %v109_v44, %v52_v21  ;;  %v116_v48 = vmul.f32 %v102_v45, %v52_v21  ;;  %v160_v61 = vcombine.high %v134_v55, %v142_v49  ;;  %v159_v62 = vcombine.low %v134_v55, %v142_v49 }
  0xb0   :  { %v126_v53 = vadd.f32 %v118_v30, %v117_v47  ;;  %v125_v54 = vadd.f32 %v118_v30, %v116_v48  ;;  %v174_v2 = vrot.slane %v160_v61, %v166_v58  ;;  %v167_v4 = vrot.slane %v159_v62, %v166_v58 }
  0xb2   :  { %v151_v56 = vcombine.low %v124_v51, %v126_v53  ;;  %v143_v57 = vcombine.low %v123_v52, %v125_v54 }
  0xb4   :  { %v158_v59 = vrot.slane %v151_v56, %v133_v43  ;;  %v150_v60 = vrot.slane %v143_v57, %v133_v43 }
  0xb6   :  { %v176_v63 = vcombine.high %v150_v60, %v158_v59  ;;  %v175_v0 = vcombine.low %v150_v60, %v158_v59 }
  0xb8   :  { %v190_v3 = vrot.slane %v176_v63, %v166_v58  ;;  %v183_v5 = vrot.slane %v175_v0, %v166_v58 }
  0xba   :  { %v193_v6 = vcombine.low %v174_v2, %v190_v3  ;;  %v192_v7 = vcombine.high %v167_v4, %v183_v5  ;;  %v191_v8 = vcombine.low %v167_v4, %v183_v5  ;;  %v194_v9 = vcombine.high %v174_v2, %v190_v3 }
  0xbc   :  { %200 = vrot.lane.b32.xlu1 %v193_v6, %s335_s0  ;;  %196 = vrot.lane.b32.xlu0 %v192_v7, %s330_s21 }
  0xc0   :  { %204 = vrot.lane.b32.xlu0 %v194_v9, %s336_s2 }
 0x12e   :  { %v197_v1 = vpop.permute.xlu0 %196  ;;  %v201_v10 = vpop.permute.xlu1 %200 }
 0x12f   :  { %v208_v11 = vsel %vm207_vm0, %v191_v8, %v197_v1 }
 0x130   :  { %v210_v13 = vsel %vm209_vm1, %v208_v11, %v201_v10 }
 0x132   :  { %v205_v12 = vpop.permute.xlu0 %204 }
 0x133   :  { %v212_v14 = vsel %vm211_vm2, %v210_v13, %v205_v12 }
 0x134   :  { %213 = vst [vmem:[#allocation8] sm:$0xff] %v212_v14 }
 0x135   :  { %218 = vsyncadd [#allocation4], 96  ;;  %s337_s29 = smov [#allocation8]  }
 0x136   :  { %s219_s30 = sshll.u32 %s337_s29, 4  ;;  %s220_s30 = int_to_ptr.vmem [resolvable:$true] %s219_s30 }
 0x137   :  { %s302_s4 = scalar_lea.vmem %s220_s30, 32  ;;  %s306_s5 = scalar_lea.vmem %s220_s30, 128 }
 0x138   :  { %p303_p1 = scmp.ne.s32.totalorder %s220_s30, %s302_s4  ;;  %p307_p2 = scmp.lt.s32.totalorder %s220_s30, %s220_s30 }
 0x139   :  { %p308_p3 = scmp.lt.s32.totalorder %s306_s5, %s302_s4 }
 0x13b   :  { %p309_p4 = por %p308_p3, %p307_p2 }
 0x13d   :  { %p310_p5 = pnand %p309_p4, %p303_p1 }
 0x13f   :  { %313 = shalt.err (!%p310_p5)
}
 0x140   :  { %225 = dma.vmem_to_hbm [thread:$0]  %s220_s30, 32, %s392_s3, [#allocation4], %s330_s21, %s330_s21, %s331_s22  }
 0x141   :  { %326 = dma.done.wait [#allocation4], 128  }
 0x142   :  { %327 = vsyncadd [#allocation4], 4294967168 }
 0x143   :  { %229 = vsyncpa [#allocation3], 1 }
 0x144   :  { %230 = vsyncpa [#allocation6], 1 }
 0x145   :  { %231 = vsyncpa [#allocation4], 1 }

</bundles_post_ra>
